<compile_context>
chip_gen: v5e
topology: v5e:2x2
jax: 0.10.0
libtpu: 0.0.40
codegen_flags: <defaults>
</compile_context>

<pallas_src>
import jax
import jax.numpy as jnp
from jax.experimental import pallas as pl
from jax.experimental.pallas import tpu as pltpu


def _nce_kernel(pred_ref, labels_ref, loss_ref):
    pred = pred_ref[...].astype(jnp.float32)               # (C, TN), classes on sublanes
    labels = labels_ref[...]                                 # (1, TN) int32
    c, tn = pred.shape

    # numerically stable log-sum-exp over the class (sublane) axis
    m = jnp.max(pred, axis=0, keepdims=True)                 # (1, TN)
    e = jnp.exp(pred - m)                                     # (C, TN) — only (C,TN) EUP op
    lse = m + jnp.log(jnp.sum(e, axis=0, keepdims=True))      # (1, TN)

    # gather pred[labels[n], n] via a sublane select + sublane reduce
    class_ids = jax.lax.broadcasted_iota(jnp.int32, (c, tn), 0)
    pred_label = jnp.sum(jnp.where(class_ids == labels, pred, 0.0),
                         axis=0, keepdims=True)               # (1, TN)

    num = lse - pred_label                                     # -log_softmax[n, labels[n]]
    den = jnp.sum(lse - pred, axis=0, keepdims=True)           # -sum_c log_softmax[n, c] (stable)
    # exact divide: validation tolerance is 1e-5, approx reciprocal is too coarse
    loss_ref[...] = (num / den).astype(loss_ref.dtype)


def _vmem_budget_and_limit():
    """Per-generation VMEM budgeting (v7x: 64 MiB physical; v5e/v6e: 128 MiB)."""
    try:
        kind = jax.devices()[0].device_kind.lower()
    except Exception:
        kind = ""
    if kind and ("v7" not in kind):
        return 40 * 1024 * 1024, 64 * 1024 * 1024   # v5e / v6e
    return 20 * 1024 * 1024, 32 * 1024 * 1024       # v7x (or unknown: stay conservative)


def _pick_tile(n, c, itemsize, vmem_budget):
    """Batch-rows-per-tile (lane dim). Multiple of 128, VMEM-budgeted."""
    c_sub = ((c + 7) // 8) * 8                  # class axis pads to sublane multiple
    # per batch row (one lane column of the (C, TN) tile):
    #   2x double-buffered native-dtype input block
    # + ~4 f32-sized temporaries (upcast, exp, select, per-row vectors)
    per_col = 2 * c_sub * itemsize + 4 * c_sub * 4
    tn = vmem_budget // max(per_col, 1)
    tn = max(128, (tn // 128) * 128)
    tn = min(tn, 8192)                           # amortizes ~0.35us/step well past here
    n_lane = ((n + 127) // 128) * 128
    if n_lane >= 256:
        # keep >=2 grid steps so both v7x TensorCores get work
        tn = min(tn, max(128, ((n_lane // 2) // 128) * 128))
    else:
        tn = 128
    return tn


def nce_loss(pred, labels, *, num_classes, scale=1.0, block_cols=None):
    """pred: (N, C) logits (any float dtype); labels: (N,) int; returns scalar loss."""
    n, c = pred.shape
    assert c == num_classes

    vmem_budget, vmem_limit = _vmem_budget_and_limit()
    tn = _pick_tile(n, c, jnp.dtype(pred.dtype).itemsize, vmem_budget) \
        if block_cols is None else block_cols
    assert tn % 128 == 0

    n_pad = ((n + tn - 1) // tn) * tn

    # batch on the lane axis: kernel sees (C, TN) tiles
    pred_t = pred.T                                            # (C, N) layout plumbing
    if n_pad != n:
        pred_t = jnp.pad(pred_t, ((0, 0), (0, n_pad - n)))
        labels = jnp.pad(labels, ((0, n_pad - n),))
    labels2d = labels.astype(jnp.int32).reshape(1, n_pad)

    grid = (n_pad // tn,)
    per_row = pl.pallas_call(
        _nce_kernel,
        out_shape=jax.ShapeDtypeStruct((1, n_pad), jnp.float32),
        grid_spec=pltpu.PrefetchScalarGridSpec(
            num_scalar_prefetch=0,
            grid=grid,
            in_specs=[
                pl.BlockSpec((c, tn), lambda i: (0, i)),   # pred tile (native dtype)
                pl.BlockSpec((1, tn), lambda i: (0, i)),   # labels tile (lane-dense)
            ],
            out_specs=pl.BlockSpec((1, tn), lambda i: (0, i)),  # lane-dense per-row loss
        ),
        compiler_params=pltpu.CompilerParams(
            dimension_semantics=("parallel",),
            vmem_limit_bytes=vmem_limit,
        ),
    )(pred_t, labels2d)

    # padded rows are sliced away before the mean -> divisor stays the global N
    return jnp.float32(scale) * jnp.mean(per_row[0, :n])


def nce_loss_ref(pred, labels, num_classes, scale=1.0):
    """Pure-JAX reference mirroring the PyTorch forward, for validation."""
    logp = jax.nn.log_softmax(pred.astype(jnp.float32), axis=1)
    onehot = jax.nn.one_hot(labels, num_classes, dtype=jnp.float32)
    loss = -jnp.sum(onehot * logp, axis=1) / -jnp.sum(logp, axis=1)
    return scale * jnp.mean(loss)


if __name__ == "__main__":
    num_classes = 12
    scale = 0.5
    key = jax.random.PRNGKey(0)

    # batch=10 exercises the padding path (single tile); batch=300 exercises a
    # multi-step grid (>=2 tiles, v7x megacore path).
    for batch in (10, 300):
        key, k_pred, k_lab = jax.random.split(key, 3)
        pred = jax.random.normal(k_pred, (batch, num_classes), dtype=jnp.float32)
        labels = jax.random.randint(k_lab, (batch,), 0, num_classes, dtype=jnp.int32)

        loss = nce_loss(pred, labels, num_classes=num_classes, scale=scale)
        loss = jax.block_until_ready(loss)

        ref = nce_loss_ref(pred, labels, num_classes, scale=scale)
        assert jnp.allclose(loss, ref, rtol=1e-5, atol=1e-5), (batch, float(loss), float(ref))

    print("KERNEL_OK")
</pallas_src>

<mosaic_0001>
module attributes {stable_mosaic.version = 11 : i64} {
  func.func @_nce_kernel(%arg0: i32, %arg1: memref<12x128xf32, #tpu.memory_space<vmem>>, %arg2: memref<1x128xi32, #tpu.memory_space<vmem>>, %arg3: memref<1x128xf32, #tpu.memory_space<vmem>>) attributes {dimension_semantics = [#tpu.dimension_semantics<parallel>], iteration_bounds = array<i64: 1>, scalar_prefetch = 0 : i64, scratch_operands = 0 : i64, tpu.core_type = #tpu.core_type<tc>, window_params = [{transform_indices = @transform_0, window_bounds = array<i64: 12, 128>}, {transform_indices = @transform_1, window_bounds = array<i64: 1, 128>}, {transform_indices = @transform_2, window_bounds = array<i64: 1, 128>}]} {
    %c0 = arith.constant 0 : index
    %c0_0 = arith.constant 0 : index
    %0 = vector.load %arg1[%c0, %c0_0] : memref<12x128xf32, #tpu.memory_space<vmem>>, vector<12x128xf32>
    %c0_1 = arith.constant 0 : index
    %c0_2 = arith.constant 0 : index
    %1 = vector.load %arg2[%c0_1, %c0_2] : memref<1x128xi32, #tpu.memory_space<vmem>>, vector<1x128xi32>
    %cst = arith.constant dense<0xFF800000> : vector<128xf32>
    %2 = vector.multi_reduction <maximumf>, %0, %cst [0] : vector<12x128xf32> to vector<128xf32>
    %3 = vector.shape_cast %2 : vector<128xf32> to vector<1x128xf32>
    %4 = vector.broadcast %3 : vector<1x128xf32> to vector<12x128xf32>
    %5 = arith.subf %0, %4 : vector<12x128xf32>
    %6 = math.exp %5 : vector<12x128xf32>
    %cst_3 = arith.constant dense<0.000000e+00> : vector<128xf32>
    %7 = vector.multi_reduction <add>, %6, %cst_3 [0] : vector<12x128xf32> to vector<128xf32>
    %8 = vector.shape_cast %7 : vector<128xf32> to vector<1x128xf32>
    %9 = math.log %8 : vector<1x128xf32>
    %10 = arith.addf %3, %9 : vector<1x128xf32>
    %11 = tpu.iota {dimensions = array<i32: 0>} : vector<12x128xi32>
    %12 = vector.broadcast %1 : vector<1x128xi32> to vector<12x128xi32>
    %13 = arith.cmpi eq, %11, %12 : vector<12x128xi32>
    %cst_4 = arith.constant 0.000000e+00 : f32
    %14 = vector.broadcast %cst_4 : f32 to vector<12x128xf32>
    %15 = arith.select %13, %0, %14 : vector<12x128xi1>, vector<12x128xf32>
    %cst_5 = arith.constant dense<0.000000e+00> : vector<128xf32>
    %16 = vector.multi_reduction <add>, %15, %cst_5 [0] : vector<12x128xf32> to vector<128xf32>
    %17 = vector.shape_cast %16 : vector<128xf32> to vector<1x128xf32>
    %18 = arith.subf %10, %17 : vector<1x128xf32>
    %19 = vector.broadcast %10 : vector<1x128xf32> to vector<12x128xf32>
    %20 = arith.subf %19, %0 : vector<12x128xf32>
    %cst_6 = arith.constant dense<0.000000e+00> : vector<128xf32>
    %21 = vector.multi_reduction <add>, %20, %cst_6 [0] : vector<12x128xf32> to vector<128xf32>
    %22 = vector.shape_cast %21 : vector<128xf32> to vector<1x128xf32>
    %23 = arith.divf %18, %22 : vector<1x128xf32>
    %c0_7 = arith.constant 0 : index
    %c0_8 = arith.constant 0 : index
    %24 = vector.load %arg3[%c0_7, %c0_8] : memref<1x128xf32, #tpu.memory_space<vmem>>, vector<1x128xf32>
    tpu.vector_store %arg3[%c0_7, %c0_8], %23 {strides = array<i32>} : memref<1x128xf32, #tpu.memory_space<vmem>>, vector<1x128xf32>,
    return
  }
  func.func @transform_0(%arg0: i32) -> (i32, i32) {
    %c0_i32 = arith.constant 0 : i32
    %c0_i32_0 = arith.constant 0 : i32
    return %c0_i32, %arg0 : i32, i32
  }
  func.func @transform_1(%arg0: i32) -> (i32, i32) {
    %c0_i32 = arith.constant 0 : i32
    %c0_i32_0 = arith.constant 0 : i32
    return %c0_i32, %arg0 : i32, i32
  }
  func.func @transform_2(%arg0: i32) -> (i32, i32) {
    %c0_i32 = arith.constant 0 : i32
    %c0_i32_0 = arith.constant 0 : i32
    return %c0_i32, %arg0 : i32, i32
  }
}

</mosaic_0001>

<bundles_post_ra>
// kernel: tpu_custom_call.1
= control target key start
LH: loop header
LB: loop body
LE: loop exit
PB: predicated region body
PF: predicated region fallthrough
CT: control target
= control target key end

     0   :  { %7 = vsyncpa [#allocation3], 0  ;;  %s257_s0 = inlined_call_operand.hbm [shape: f32[12,128], index: 0, kind: input, shape index: {}]   ;;  %s258_s1 = inlined_call_operand.hbm [shape: s32[1,128], index: 1, kind: input, shape index: {}]   ;;  %s259_s2 = inlined_call_operand.hbm [shape: f32[1,128], index: 2, kind: output, shape index: {}]  }
   0x1   :  { %8 = vsyncpa [#allocation6], 0 }
   0x2   :  { %9 = vsyncpa [#allocation4], 0  ;;  %s14_s11 = sshll.u32 %s257_s0, 4  ;;  %s224_s12 = smov [#allocation2]   ;;  %s15_s11 = int_to_ptr.hbm [resolvable:$true] %s14_s11 }
   0x3   :  { %s16_s13 = sshll.u32 %s224_s12, 4  ;;  %s28_s16 = sshll.u32 %s258_s1, 4  ;;  %s17_s13 = int_to_ptr.vmem [resolvable:$true] %s16_s13  ;;  %s29_s16 = int_to_ptr.hbm [resolvable:$true] %s28_s16 }
   0x4   :  { %s225_s17 = smov 128   ;;  %s226_s18 = smov 8  }
   0x5   :  { %22 = dma.hbm_to_vmem [thread:$0]  %s15_s11, 256, %s17_s13, [#allocation3], %s225_s17, %s225_s17, %s226_s18  }
   0x6   :  { %s227_s19 = smov [#allocation5]  }
   0x7   :  { %s30_s20 = sshll.u32 %s227_s19, 4  ;;  %s31_s20 = int_to_ptr.vmem [resolvable:$true] %s30_s20 }
   0x8   :  { %33 = dma.hbm_to_vmem [thread:$0]  %s29_s16, 16, %s31_s20, [#allocation6]  }
   0x9   :  { %218 = dma.done.wait [#allocation3], 256  }
   0xa   :  { %219 = vsyncadd [#allocation3], 4294967040 }
   0xb   :  { %220 = dma.done.wait [#allocation6], 16  }
   0xc   :  { %221 = vsyncadd [#allocation6], 4294967280  ;;  %vm45_vm0 = vcmask 1043456   ;;  %v42_v0 = vld [vmem:[#allocation2] sm:$0xff]  ;;  %v43_v1 = vld [vmem:[#allocation2 + $0x8] sm:$0xf]  ;;  %v71_v14 = vlaneseq }
   0xd   :  { %v46_v2 = vsel %vm45_vm0, %v43_v1, -inf  ;;  %v137_v15 = vld [vmem:[#allocation5] ss:$0 sm:$0xff]  ;;  %s228_s0 = smov [#allocation7]   ;;  %s121_s23 = sshll.u32 %s259_s2, 4  ;;  %s122_s23 = int_to_ptr.hbm [resolvable:$true] %s121_s23 }
   0xe   :  { %v47_v3 = vmax.f32 %v42_v0, %v46_v2  ;;  %v72_v16 = vshrl.u32 %v71_v14, 7  ;;  %s119_s1 = sshll.u32 %s228_s0, 4  ;;  %s120_s1 = int_to_ptr.vmem [resolvable:$true] %s119_s1 }
  0x10   :  { %v48_v4 = vrot.slane %v47_v3, 4  ;;  %v73_v17 = vadd.s32 8, %v72_v16  ;;  %vm75_vm1 = vcmp.eq.s32.totalorder %v72_v16, %v137_v15 }
  0x11   :  { %v77_v19 = vsel %vm75_vm1, %v42_v0, 0.0 }
  0x12   :  { %v49_v5 = vmax.f32 %v47_v3, %v48_v4  ;;  %vm76_vm2 = vcmp.eq.s32.totalorder %v73_v17, %v137_v15 }
  0x13   :  { %v78_v21 = vsel %vm76_vm2, %v43_v1, 0.0 }
  0x14   :  { %v50_v6 = vrot.slane %v49_v5, 2  ;;  %v79_v23 = vsel %vm45_vm0, %v78_v21, 0.0 }
  0x15   :  { %v80_v25 = vadd.f32 %v79_v23, %v77_v19 }
  0x16   :  { %v51_v7 = vmax.f32 %v49_v5, %v50_v6 }
  0x17   :  { %v81_v39 = vrot.slane %v80_v25, 4 }
  0x18   :  { %v52_v8 = vrot.slane %v51_v7, 1 }
  0x19   :  { %v82_v42 = vadd.f32 %v81_v39, %v80_v25 }
  0x1a   :  { %v53_v9 = vmax.f32 %v51_v7, %v52_v8 }
  0x1b   :  { %v83_v45 = vrot.slane %v82_v42, 2 }
  0x1c   :  { %v54_v10 = vsub.f32 %v42_v0, %v53_v9  ;;  %v55_v11 = vsub.f32 %v43_v1, %v53_v9 }
  0x1d   :  { %v84_v48 = vadd.f32 %v83_v45, %v82_v42 }
  0x1e   :  { %v56_v12 = vmul.f32 1.442695, %v54_v10  ;;  %v58_v13 = vmul.f32 1.442695, %v55_v11 }
  0x1f   :  { %v85_v49 = vrot.slane %v84_v48, 1 }
  0x20   :  { %138 = vpow2.f32 %v56_v12 }
  0x21   :  { %140 = vpow2.f32 %v58_v13  ;;  %v86_v52 = vadd.f32 %v85_v49, %v84_v48 }
  0x26   :  { %v139_v18 = vpop.eup %138 }
  0x27   :  { %v141_v20 = vpop.eup %140 }
  0x28   :  { %v60_v22 = vsel %vm45_vm0, %v141_v20, 0.0 }
  0x29   :  { %v61_v24 = vadd.f32 %v139_v18, %v60_v22 }
  0x2b   :  { %v62_v26 = vrot.slane %v61_v24, 4 }
  0x2d   :  { %v63_v27 = vadd.f32 %v62_v26, %v61_v24 }
  0x2f   :  { %v64_v28 = vrot.slane %v63_v27, 2 }
  0x31   :  { %v65_v29 = vadd.f32 %v64_v28, %v63_v27 }
  0x33   :  { %v66_v30 = vrot.slane %v65_v29, 1 }
  0x35   :  { %v67_v31 = vadd.f32 %v66_v30, %v65_v29 }
  0x37   :  { %142 = vlog2.f32 %v67_v31 }
  0x3d   :  { %v143_v32 = vpop.eup %142 }
  0x3e   :  { %v69_v33 = vmul.f32 0.6931472, %v143_v32 }
  0x40   :  { %v70_v34 = vadd.f32 %v69_v33, %v53_v9 }
  0x42   :  { %v88_v35 = vsub.f32 %v70_v34, %v42_v0  ;;  %v89_v36 = vsub.f32 %v70_v34, %v43_v1  ;;  %v87_v58 = vsub.f32 %v70_v34, %v86_v52 }
  0x44   :  { %v90_v37 = vsel %vm45_vm0, %v89_v36, 0.0 }
  0x45   :  { %v91_v38 = vadd.f32 %v90_v37, %v88_v35 }
  0x47   :  { %v92_v40 = vrot.slane %v91_v38, 4 }
  0x49   :  { %v93_v41 = vadd.f32 %v92_v40, %v91_v38 }
  0x4b   :  { %v94_v43 = vrot.slane %v93_v41, 2 }
  0x4d   :  { %v95_v44 = vadd.f32 %v94_v43, %v93_v41 }
  0x4f   :  { %v96_v46 = vrot.slane %v95_v44, 1 }
  0x51   :  { %v97_v47 = vadd.f32 %v96_v46, %v95_v44 }
  0x53   :  { %144 = vrcp.f32 %v97_v47  ;;  %v109_v53 = vand.u32 2147483648, %v97_v47  ;;  %vm103_vm3 = vweird.f32 %v97_v47  ;;  %v107_v55 = vand.u32 2147483647, %v97_v47 }
  0x55   :  { %v110_v57 = vor.u32 1.1754944e-38, %v109_v53  ;;  %vm108_vm6 = vcmp.eq.f32.partialorder %v107_v55, 8.507059e+37 }
  0x59   :  { %v145_v50 = vpop.eup %144 }
  0x5a   :  { %v99_v51 = vmul.f32 %v145_v50, %v97_v47  ;;  %vm104_vm4 = vweird.f32 %v145_v50 }
  0x5b   :  { %vm105_vm5 = vmor %vm103_vm3, %vm104_vm4 }
  0x5c   :  { %v100_v54 = vsub.f32 1.0, %v99_v51 }
  0x5e   :  { %v101_v56 = vmul.f32 %v145_v50, %v100_v54 }
  0x60   :  { %v102_v59 = vadd.f32 %v145_v50, %v101_v56 }
  0x62   :  { %v106_v60 = vsel %vm105_vm5, %v145_v50, %v102_v59 }
  0x63   :  { %v111_v61 = vsel %vm108_vm6, %v110_v57, %v106_v60 }
  0x64   :  { %v112_v62 = vmul.f32 %v111_v61, %v87_v58 }
  0x66   :  { %113 = vst [vmem:[#allocation7] sm:$0x1] %v112_v62 }
  0x67   :  { %124 = dma.vmem_to_hbm [thread:$0]  %s120_s1, 16, %s122_s23, [#allocation4]  }
  0x68   :  { %222 = dma.done.wait [#allocation4], 16  }
  0x69   :  { %223 = vsyncadd [#allocation4], 4294967280 }
  0x6a   :  { %129 = vsyncpa [#allocation3], 1 }
  0x6b   :  { %130 = vsyncpa [#allocation6], 1 }
  0x6c   :  { %131 = vsyncpa [#allocation4], 1 }

</bundles_post_ra>
